<compile_context>
chip_gen: v5e
topology: v5e:2x2
jax: 0.10.0
libtpu: 0.0.40
codegen_flags: <defaults>
</compile_context>

<pallas_src>
import jax
import jax.numpy as jnp
from jax import lax
from jax.experimental import pallas as pl
from jax.experimental.pallas import tpu as pltpu

# ---------------- small smoke-test config (toy-sized, matches module layout) ----------------
B = 2               # batch
T = 8               # num_image_tokens
VISION_HID = 32     # vision_config.hidden_size
PROJ_DIM = 128      # vision_config.projection_dim (multiple of 128 -> lane-dense output)
# TODO(synk): production PaliGemma is T=256, VISION_HID=1152, PROJ_DIM=2048; tune tm there.


# ---------------- fused linear + bias kernel ----------------
def _projector_kernel(x_ref, w_ref, b_ref, o_ref):
    # x_ref: (tm, K) bf16 activation tile
    # w_ref: (N, K)  bf16 weight in nn.Linear layout, VMEM-resident across the grid
    # b_ref: (1, N)  f32 bias, VMEM-resident
    # o_ref: (tm, N) output tile
    acc = lax.dot_general(
        x_ref[...], w_ref[...],
        dimension_numbers=(((1,), (1,)), ((), ())),   # contract K of x with K of w (no transpose op)
        preferred_element_type=jnp.float32)
    o_ref[...] = (acc + b_ref[...]).astype(o_ref.dtype)


def _pick_m_tile(m, pref, granule):
    """Largest multiple of `granule` <= pref that evenly divides m, else the full dim."""
    if m <= pref:
        return m
    t = (pref // granule) * granule
    while t >= granule:
        if m % t == 0:
            return t
        t -= granule
    return m  # fallback: single full-M tile (always legal)


def multimodal_projector(image_features, weight, bias, *,
                         tm_pref=512, compute_dtype=jnp.bfloat16):
    """image_features: (B, T, K); weight: (N, K) [nn.Linear layout]; bias: (N,)."""
    b, t, k = image_features.shape
    n = weight.shape[0]
    m = b * t
    out_dtype = image_features.dtype

    # Cast streaming operands to bf16 (f32 accumulation preserved inside the kernel).
    x2d = image_features.reshape(m, k).astype(compute_dtype)
    w = weight.astype(compute_dtype)                 # keep (N, K): no wrapper transpose
    bias2d = bias.astype(jnp.float32).reshape(1, n)

    sub_granule = 16 if compute_dtype == jnp.bfloat16 else 8
    tm = _pick_m_tile(m, tm_pref, sub_granule)

    xb = jnp.dtype(compute_dtype).itemsize
    ob = jnp.dtype(out_dtype).itemsize
    # Double-buffered x/out tiles + (conservatively double-buffered) resident weight + bias.
    vmem_bytes = (2 * tm * k * xb + 2 * tm * n * ob
                  + 2 * n * k * xb + 2 * n * 4 + (2 << 20))
    vmem_limit = int(min(max(vmem_bytes, 4 << 20), 64 << 20))   # stay within v7x physical VMEM

    cost = pl.CostEstimate(
        flops=2 * m * k * n,
        transcendentals=0,
        bytes_accessed=m * k * xb + n * k * xb + n * 4 + m * n * ob)

    out2d = pl.pallas_call(
        _projector_kernel,
        out_shape=jax.ShapeDtypeStruct((m, n), out_dtype),
        grid_spec=pltpu.PrefetchScalarGridSpec(
            num_scalar_prefetch=0,
            grid=(m // tm,),                                   # 1-D grid over M only
            in_specs=[
                pl.BlockSpec((tm, k), lambda i: (i, 0)),       # streamed activation tiles
                pl.BlockSpec((n, k), lambda i: (0, 0)),        # weight fetched once, stays resident
                pl.BlockSpec((1, n), lambda i: (0, 0)),        # bias resident
            ],
            out_specs=pl.BlockSpec((tm, n), lambda i: (i, 0)), # lane-dense output tiles
        ),
        compiler_params=pltpu.CompilerParams(
            dimension_semantics=("parallel",),                 # megacore-shardable M axis
            vmem_limit_bytes=vmem_limit),
        cost_estimate=cost,
    )(x2d, w, bias2d)
    return out2d.reshape(b, t, n)


# ---------------- pure-JAX reference (mirrors the PyTorch forward, bf16-consistent) ----------------
def reference_forward(image_features, weight, bias, compute_dtype=jnp.bfloat16):
    x = image_features.astype(compute_dtype).astype(jnp.float32)
    w = weight.astype(compute_dtype).astype(jnp.float32)
    return x @ w.T + bias.astype(jnp.float32)


# ---------------- main ----------------
if __name__ == "__main__":
    key = jax.random.PRNGKey(0)
    k_x, k_w, k_b = jax.random.split(key, 3)

    image_features = jax.random.normal(k_x, (B, T, VISION_HID), jnp.float32)
    # nn.Linear(vision_hidden_size, projection_dim, bias=True): weight (out, in), bias (out,)
    weight = 0.02 * jax.random.normal(k_w, (PROJ_DIM, VISION_HID), jnp.float32)
    bias = 0.02 * jax.random.normal(k_b, (PROJ_DIM,), jnp.float32)

    out = multimodal_projector(image_features, weight, bias)
    out = jax.block_until_ready(out)

    ref = reference_forward(image_features, weight, bias)
    assert out.shape == (B, T, PROJ_DIM)
    assert jnp.allclose(out, ref.astype(out.dtype), rtol=1e-4, atol=1e-4), (
        float(jnp.max(jnp.abs(out - ref))))

    print("KERNEL_OK")
</pallas_src>

<mosaic_0001>
module attributes {stable_mosaic.version = 11 : i64} {
  func.func @_projector_kernel(%arg0: i32, %arg1: memref<16x32xbf16, #tpu.memory_space<vmem>>, %arg2: memref<128x32xbf16, #tpu.memory_space<vmem>>, %arg3: memref<1x128xf32, #tpu.memory_space<vmem>>, %arg4: memref<16x128xf32, #tpu.memory_space<vmem>>) attributes {dimension_semantics = [#tpu.dimension_semantics<parallel>], iteration_bounds = array<i64: 1>, scalar_prefetch = 0 : i64, scratch_operands = 0 : i64, tpu.core_type = #tpu.core_type<tc>, window_params = [{transform_indices = @transform_0, window_bounds = array<i64: 16, 32>}, {pipeline_mode = #tpu.pipeline_mode<synchronous>, transform_indices = @transform_1, window_bounds = array<i64: 128, 32>}, {pipeline_mode = #tpu.pipeline_mode<synchronous>, transform_indices = @transform_2, window_bounds = array<i64: 1, 128>}, {transform_indices = @transform_3, window_bounds = array<i64: 16, 128>}]} {
    %c0 = arith.constant 0 : index
    %c0_0 = arith.constant 0 : index
    %0 = vector.load %arg1[%c0, %c0_0] : memref<16x32xbf16, #tpu.memory_space<vmem>>, vector<16x32xbf16>
    %c0_1 = arith.constant 0 : index
    %c0_2 = arith.constant 0 : index
    %1 = vector.load %arg2[%c0_1, %c0_2] : memref<128x32xbf16, #tpu.memory_space<vmem>>, vector<128x32xbf16>
    %cst = arith.constant dense<0.000000e+00> : vector<16x128xf32>
    %2 = tpu.matmul %0, %1, %cst {dimension_numbers = #tpu.dot_dimension_numbers<[1], [1], [0], [0], [0, 0, 1, 0], [], []>} : vector<16x32xbf16>, vector<128x32xbf16>, vector<16x128xf32> -> vector<16x128xf32>
    %c0_3 = arith.constant 0 : index
    %c0_4 = arith.constant 0 : index
    %3 = vector.load %arg3[%c0_3, %c0_4] : memref<1x128xf32, #tpu.memory_space<vmem>>, vector<1x128xf32>
    %4 = vector.broadcast %3 : vector<1x128xf32> to vector<16x128xf32>
    %5 = arith.addf %2, %4 : vector<16x128xf32>
    %c0_5 = arith.constant 0 : index
    %c0_6 = arith.constant 0 : index
    %6 = vector.load %arg4[%c0_5, %c0_6] : memref<16x128xf32, #tpu.memory_space<vmem>>, vector<16x128xf32>
    tpu.vector_store %arg4[%c0_5, %c0_6], %5 {strides = array<i32>} : memref<16x128xf32, #tpu.memory_space<vmem>>, vector<16x128xf32>,
    return
  }
  func.func @transform_0(%arg0: i32) -> (i32, i32) {
    %c0_i32 = arith.constant 0 : i32
    %c0_i32_0 = arith.constant 0 : i32
    return %arg0, %c0_i32 : i32, i32
  }
  func.func @transform_1(%arg0: i32) -> (i32, i32) {
    %c0_i32 = arith.constant 0 : i32
    %c0_i32_0 = arith.constant 0 : i32
    %c0_i32_1 = arith.constant 0 : i32
    return %c0_i32, %c0_i32_0 : i32, i32
  }
  func.func @transform_2(%arg0: i32) -> (i32, i32) {
    %c0_i32 = arith.constant 0 : i32
    %c0_i32_0 = arith.constant 0 : i32
    %c0_i32_1 = arith.constant 0 : i32
    return %c0_i32, %c0_i32_0 : i32, i32
  }
  func.func @transform_3(%arg0: i32) -> (i32, i32) {
    %c0_i32 = arith.constant 0 : i32
    %c0_i32_0 = arith.constant 0 : i32
    return %arg0, %c0_i32 : i32, i32
  }
}

</mosaic_0001>

<bundles_post_ra>
// kernel: tpu_custom_call.1
= control target key start
LH: loop header
LB: loop body
LE: loop exit
PB: predicated region body
PF: predicated region fallthrough
CT: control target
= control target key end

     0   :  { %vm82_vm0 = vcmask 261120   ;;  %s285_s0 = inlined_call_operand.vmem [shape: bf16[16,32], index: 0, kind: input, shape index: {}]   ;;  %s286_s1 = inlined_call_operand.vmem [shape: bf16[128,32], index: 1, kind: input, shape index: {}]   ;;  %s287_s2 = inlined_call_operand.vmem [shape: f32[1,128], index: 2, kind: input, shape index: {}]   ;;  %s288_s3 = inlined_call_operand.hbm [shape: f32[16,128], index: 3, kind: output, shape index: {}]  }
   0x1   :  { %v189_v0 = vld [vmem:[%s286_s1 + $0x38] sm:$0xff] }
   0x2   :  { %v108_v1 = vsel %vm82_vm0, %v189_v0, 0 }
   0x3   :  { %8 = vsyncpa [#allocation3], 0  ;;  %110 = vmatpush.bf16.xpose.msra.mxu0 %v108_v1  ;;  %v188_v2 = vld [vmem:[%s286_s1 + $0x30] sm:$0xff]  ;;  %v187_v4 = vld [vmem:[%s286_s1 + $0x28] sm:$0xff]  ;;  %s220_s5 = smov [#allocation2]   ;;  %s132_s8 = sshll.u32 %s288_s3, 4  ;;  %s133_s8 = int_to_ptr.hbm [resolvable:$true] %s132_s8 }
   0x4   :  { %v105_v3 = vsel %vm82_vm0, %v188_v2, 0  ;;  %v102_v5 = vsel %vm82_vm0, %v187_v4, 0  ;;  %v186_v6 = vld [vmem:[%s286_s1 + $0x20] sm:$0xff]  ;;  %v185_v8 = vld [vmem:[%s286_s1 + $0x18] sm:$0xff]  ;;  %v184_v10 = vld [vmem:[%s286_s1 + $0x10] sm:$0xff]  ;;  %s130_s6 = sshll.u32 %s220_s5, 4  ;;  %s131_s6 = int_to_ptr.vmem [resolvable:$true] %s130_s6 }
   0x5   :  { %v99_v7 = vsel %vm82_vm0, %v186_v6, 0  ;;  %v96_v9 = vsel %vm82_vm0, %v185_v8, 0  ;;  %v93_v11 = vsel %vm82_vm0, %v184_v10, 0  ;;  %v183_v12 = vld [vmem:[%s286_s1 + $0x8] sm:$0xff]  ;;  %v182_v14 = vld [vmem:[%s286_s1] sm:$0xff]  ;;  %s222_s9 = smov 8  }
   0x6   :  { %v90_v13 = vsel %vm82_vm0, %v183_v12, 0  ;;  %v87_v15 = vsel %vm82_vm0, %v182_v14, 0  ;;  %v181_v16 = vld [vmem:[%s285_s0] sm:$0xff]  ;;  %s221_s0 = smov 128  }
   0x7   :  { %v193_v17 = vld [vmem:[%s287_s2] ss:$0 sm:$0xff] }
   0xb   :  { %111 = vmatpush.bf16.xpose.msra.mxu0 %v105_v3 }
  0x13   :  { %112 = vmatpush.bf16.xpose.msra.mxu0 %v102_v5 }
  0x1b   :  { %113 = vmatpush.bf16.xpose.msra.mxu0 %v99_v7 }
  0x23   :  { %114 = vmatpush.bf16.xpose.msra.mxu0 %v96_v9 }
  0x2b   :  { %115 = vmatpush.bf16.xpose.msra.mxu0 %v93_v11 }
  0x33   :  { %116 = vmatpush.bf16.xpose.msra.mxu0 %v90_v13 }
  0x3b   :  { %117 = vmatpush.bf16.xpose.msra.mxu0 %v87_v15 }
  0x42   :  { %180 = vmatmul.msk.bf16.vlgmr.msra.gmra.mxu0 %vm82_vm0, %v181_v16 }
  0xbf   :  { %v119_v18 = vpop.f32.mrf.mxu0 }
  0xc0   :  { %v120_v19 = vadd.f32 %v193_v17, %v119_v18 }
  0xc2   :  { %124 = vst [vmem:[#allocation2] sm:$0xff] %v120_v19 }
  0xc7   :  { %v121_v20 = vpop.f32.mrf.mxu0 }
  0xc8   :  { %v122_v21 = vadd.f32 %v193_v17, %v121_v20 }
  0xca   :  { %125 = vst [vmem:[#allocation2 + $0x8] sm:$0xff] %v122_v21 }
  0xcb   :  { %138 = dma.vmem_to_hbm [thread:$0]  %s131_s6, 256, %s133_s8, [#allocation3], %s221_s0, %s221_s0, %s222_s9  }
  0xcc   :  { %218 = dma.done.wait [#allocation3], 256  }
  0xcd   :  { %219 = vsyncadd [#allocation3], 4294967040 }
  0xce   :  { %143 = vsyncpa [#allocation3], 1 }

</bundles_post_ra>
